<compile_context>
chip_gen: v7x
topology: tpu7x:2x2x1
jax: 0.10.0
libtpu: 0.0.40
codegen_flags: <defaults>
</compile_context>

<pallas_src>
import functools
import math

import jax
import jax.numpy as jnp
from jax import lax
from jax.experimental import pallas as pl
from jax.experimental.pallas import tpu as pltpu


def _round_up(x, m):
    return ((x + m - 1) // m) * m


def _arcface_kernel(cos_m, sin_m, th, mm, scale, easy_margin, tile_c,
                    x_ref, w_ref, invw_ref, invx_ref, label_ref, out_ref):
    """One (TILE_B, TILE_C) tile of the ArcFace logits."""
    j = pl.program_id(1)                           # class-tile index

    x = x_ref[...]                                 # (TB, E)  bf16
    w = w_ref[...]                                 # (TC, E)  bf16 (streamed)
    inv_w = invw_ref[...]                          # (1, TC)  f32  (streamed)
    inv_x = invx_ref[...]                          # (TB, 1)  f32  (resident per B-tile)
    lab = label_ref[...]                           # (TB, 1)  int32

    # Native bf16 MXU contraction over E, f32 accumulation; W kept (TC, E) so
    # there is no wrapper-side transpose copy of the full weight.
    cosine = lax.dot_general(
        x, w, (((1,), (1,)), ((), ())), preferred_element_type=jnp.float32)
    cosine = cosine * inv_x * inv_w
    # Clip immediately so any undefined padded-lane values stay finite.
    cosine = jnp.clip(cosine, -1.0 + 1e-07, 1.0 - 1e-07)

    TB, TC = cosine.shape
    cols = lax.broadcasted_iota(jnp.int32, (TB, TC), 1) + j * tile_c
    is_lab = cols == lab                           # (TB, TC) bool, no f32 one_hot

    # Margin math only on the label column: O(TB) instead of O(TB * TC).
    t = jnp.sum(jnp.where(is_lab, cosine, 0.0), axis=-1, keepdims=True)  # (TB, 1)
    sine_t = jnp.sqrt(jnp.maximum(1.0 - t * t, 1e-08))
    phi_t = t * cos_m - sine_t * sin_m
    if easy_margin:
        phi_t = jnp.where(t > 0.0, phi_t, t)
    else:
        phi_t = jnp.where(t > th, phi_t, t - mm)

    # out = one_hot*phi + (1-one_hot)*cosine  ==  cosine + 1[label](phi - cos_label)
    out = (cosine + jnp.where(is_lab, phi_t - t, 0.0)) * scale
    out_ref[...] = out.astype(out_ref.dtype)


def _vmem_estimate(tile_b, tile_c, E):
    """Rough per-call VMEM need (double buffers + big temporaries)."""
    w_buf = 2 * tile_c * E * 2            # bf16 weight double-buffer
    x_buf = 2 * tile_b * E * 2            # bf16 activation double-buffer
    out_buf = 2 * tile_b * tile_c * 4     # f32 output double-buffer
    small = 2 * (tile_c * 4 + 2 * tile_b * 4)
    temps = 6 * tile_b * tile_c * 4       # cosine / cols / masks / out temporaries
    return w_buf + x_buf + out_buf + small + temps


def arcface_forward(x, weight, label, *, margin=0.3, scale=16.0,
                    easy_margin=False, tile_b=256, tile_c=1024):
    """x: (B, E), weight: (C, E), label: (B,) int -> (B, C) f32 logits."""
    B, E = x.shape
    C, E2 = weight.shape
    assert E == E2

    # Class tile: lane-dense multiple of 128, no larger than needed.
    tile_c = max(128, min(_round_up(int(tile_c), 128), _round_up(C, 128)))
    # Batch tile: full batch when small, else a multiple of 8 (256 matches the
    # 256-wide MXU on v6e/v7x and bounds VMEM for large B).
    tile_b = B if B <= int(tile_b) else _round_up(int(tile_b), 8)

    x32 = x.astype(jnp.float32)
    w32 = weight.astype(jnp.float32)
    eps = jnp.float32(1e-12)

    # One-time wrapper prep (tiny vectors; the big weight is NOT copied/padded).
    inv_x = (1.0 / jnp.maximum(
        jnp.sqrt(jnp.sum(x32 * x32, axis=1, keepdims=True)), eps))        # (B, 1)
    inv_w = (1.0 / jnp.maximum(
        jnp.sqrt(jnp.sum(w32 * w32, axis=1)), eps)).reshape(1, C)          # (1, C)
    # Pad only the tiny (1, C) inv_w so its streamed blocks are fully defined.
    c_pad = _round_up(C, tile_c)
    if c_pad != C:
        inv_w = jnp.pad(inv_w, ((0, 0), (0, c_pad - C)), constant_values=1.0)

    x_bf = x32.astype(jnp.bfloat16)
    w_bf = weight.astype(jnp.bfloat16)          # (C, E), streamed directly
    label2d = label.reshape(B, 1).astype(jnp.int32)

    cos_m = float(math.cos(margin))
    sin_m = float(math.sin(margin))
    th = float(math.cos(math.pi - margin))
    mm = float(math.sin(math.pi - margin) * margin)

    kernel = functools.partial(_arcface_kernel, cos_m, sin_m, th, mm,
                               float(scale), bool(easy_margin), tile_c)

    grid = (pl.cdiv(B, tile_b), c_pad // tile_c)
    vmem_limit = int(min(max(_vmem_estimate(tile_b, tile_c, E) * 2, 16 << 20),
                         48 << 20))

    out = pl.pallas_call(
        kernel,
        out_shape=jax.ShapeDtypeStruct((B, C), jnp.float32),
        grid_spec=pltpu.PrefetchScalarGridSpec(
            num_scalar_prefetch=0,
            grid=grid,
            in_specs=[
                pl.BlockSpec((tile_b, E), lambda i, j: (i, 0)),       # x (bf16)
                pl.BlockSpec((tile_c, E), lambda i, j: (j, 0)),       # W (bf16, streamed)
                pl.BlockSpec((1, tile_c), lambda i, j: (0, j)),       # 1/||w|| (streamed)
                pl.BlockSpec((tile_b, 1), lambda i, j: (i, 0)),       # 1/||x||
                pl.BlockSpec((tile_b, 1), lambda i, j: (i, 0)),       # label
            ],
            out_specs=pl.BlockSpec((tile_b, tile_c), lambda i, j: (i, j)),
        ),
        compiler_params=pltpu.CompilerParams(
            dimension_semantics=("parallel", "parallel"),
            vmem_limit_bytes=vmem_limit,
        ),
    )(x_bf, w_bf, inv_w, inv_x, label2d)

    return out


def _reference(x, weight, label, *, margin=0.3, scale=16.0, easy_margin=False,
               matmul_dtype=jnp.bfloat16):
    """Pure-JAX reference mirroring the kernel's bf16 matmul quantization."""
    eps = 1e-12
    inv_x = 1.0 / jnp.maximum(
        jnp.sqrt(jnp.sum(x * x, axis=1, keepdims=True)), eps)
    inv_w = 1.0 / jnp.maximum(
        jnp.sqrt(jnp.sum(weight * weight, axis=1, keepdims=True)), eps)
    raw = jnp.dot(x.astype(matmul_dtype), weight.astype(matmul_dtype).T,
                  preferred_element_type=jnp.float32)
    cosine = jnp.clip(raw * inv_x * inv_w.T, -1.0 + 1e-07, 1.0 - 1e-07)
    sine = jnp.sqrt(jnp.maximum(1.0 - cosine ** 2, 1e-08))
    phi = cosine * math.cos(margin) - sine * math.sin(margin)
    th = math.cos(math.pi - margin)
    mm = math.sin(math.pi - margin) * margin
    if easy_margin:
        phi = jnp.where(cosine > 0, phi, cosine)
    else:
        phi = jnp.where(cosine > th, phi, cosine - mm)
    one_hot = jax.nn.one_hot(label, cosine.shape[1], dtype=cosine.dtype)
    return (one_hot * phi + (1.0 - one_hot) * cosine) * scale


if __name__ == "__main__":
    # Small shapes consistent with the module: embedding_size=128 (default),
    # num_classes=512, batch=8; tile_c=128 so the class grid axis iterates.
    B, E, C = 8, 128, 512
    key = jax.random.PRNGKey(0)
    kx, kw, kl = jax.random.split(key, 3)

    x = jax.random.normal(kx, (B, E), dtype=jnp.float32)

    # Deterministic xavier_uniform init of weight (C, E): U(-a, a), a=sqrt(6/(C+E))
    a = math.sqrt(6.0 / (C + E))
    weight = jax.random.uniform(kw, (C, E), dtype=jnp.float32, minval=-a, maxval=a)

    label = jax.random.randint(kl, (B,), 0, C, dtype=jnp.int32)

    ok = True
    for easy in (False, True):
        out = arcface_forward(x, weight, label, margin=0.3, scale=16.0,
                              easy_margin=easy, tile_b=256, tile_c=128)
        out = jax.block_until_ready(out)
        ref = _reference(x, weight, label, margin=0.3, scale=16.0,
                         easy_margin=easy)
        ok &= out.shape == (B, C)
        ok &= bool(jnp.allclose(out, ref, atol=2e-3, rtol=2e-3))

    assert ok, "mismatch vs reference"
    print("KERNEL_OK")
</pallas_src>

<mosaic_0001>
module attributes {stable_mosaic.version = 11 : i64} {
  func.func @_arcface_kernel(%arg0: i32, %arg1: i32, %arg2: memref<8x128xbf16, #tpu.memory_space<vmem>>, %arg3: memref<128x128xbf16, #tpu.memory_space<vmem>>, %arg4: memref<1x128xf32, #tpu.memory_space<vmem>>, %arg5: memref<8x1xf32, #tpu.memory_space<vmem>>, %arg6: memref<8x1xi32, #tpu.memory_space<vmem>>, %arg7: memref<8x128xf32, #tpu.memory_space<vmem>>) attributes {dimension_semantics = [#tpu.dimension_semantics<parallel>, #tpu.dimension_semantics<parallel>], iteration_bounds = array<i64: 1, 4>, scalar_prefetch = 0 : i64, scratch_operands = 0 : i64, tpu.core_type = #tpu.core_type<tc>, window_params = [{transform_indices = @transform_0, window_bounds = array<i64: 8, 128>}, {transform_indices = @transform_1, window_bounds = array<i64: 128, 128>}, {transform_indices = @transform_2, window_bounds = array<i64: 1, 128>}, {transform_indices = @transform_3, window_bounds = array<i64: 8, 1>}, {transform_indices = @transform_4, window_bounds = array<i64: 8, 1>}, {transform_indices = @transform_5, window_bounds = array<i64: 8, 128>}]} {
    %c0 = arith.constant 0 : index
    %c0_0 = arith.constant 0 : index
    %0 = vector.load %arg2[%c0, %c0_0] : memref<8x128xbf16, #tpu.memory_space<vmem>>, vector<8x128xbf16>
    %c0_1 = arith.constant 0 : index
    %c0_2 = arith.constant 0 : index
    %1 = vector.load %arg3[%c0_1, %c0_2] : memref<128x128xbf16, #tpu.memory_space<vmem>>, vector<128x128xbf16>
    %c0_3 = arith.constant 0 : index
    %c0_4 = arith.constant 0 : index
    %2 = vector.load %arg4[%c0_3, %c0_4] : memref<1x128xf32, #tpu.memory_space<vmem>>, vector<1x128xf32>
    %c0_5 = arith.constant 0 : index
    %c0_6 = arith.constant 0 : index
    %3 = vector.load %arg5[%c0_5, %c0_6] : memref<8x1xf32, #tpu.memory_space<vmem>>, vector<8x1xf32>
    %c0_7 = arith.constant 0 : index
    %c0_8 = arith.constant 0 : index
    %4 = vector.load %arg6[%c0_7, %c0_8] : memref<8x1xi32, #tpu.memory_space<vmem>>, vector<8x1xi32>
    %cst = arith.constant dense<0.000000e+00> : vector<8x128xf32>
    %5 = tpu.matmul %0, %1, %cst {dimension_numbers = #tpu.dot_dimension_numbers<[1], [1], [0], [0], [0, 0, 1, 0], [], []>} : vector<8x128xbf16>, vector<128x128xbf16>, vector<8x128xf32> -> vector<8x128xf32>
    %6 = vector.broadcast %3 : vector<8x1xf32> to vector<8x128xf32>
    %7 = arith.mulf %5, %6 : vector<8x128xf32>
    %8 = vector.broadcast %2 : vector<1x128xf32> to vector<8x128xf32>
    %9 = arith.mulf %7, %8 : vector<8x128xf32>
    %cst_9 = arith.constant -0.99999988 : f32
    %cst_10 = arith.constant 0.99999988 : f32
    %10 = vector.broadcast %cst_9 : f32 to vector<8x128xf32>
    %11 = arith.maximumf %10, %9 : vector<8x128xf32>
    %12 = vector.broadcast %cst_10 : f32 to vector<8x128xf32>
    %13 = arith.minimumf %12, %11 : vector<8x128xf32>
    %14 = tpu.iota {dimensions = array<i32: 1>} : vector<8x128xi32>
    %c128_i32 = arith.constant 128 : i32
    %15 = arith.muli %arg1, %c128_i32 : i32
    %16 = vector.broadcast %15 : i32 to vector<8x128xi32>
    %17 = arith.addi %14, %16 : vector<8x128xi32>
    %18 = vector.broadcast %4 : vector<8x1xi32> to vector<8x128xi32>
    %19 = arith.cmpi eq, %17, %18 : vector<8x128xi32>
    %cst_11 = arith.constant 0.000000e+00 : f32
    %20 = vector.broadcast %cst_11 : f32 to vector<8x128xf32>
    %21 = arith.select %19, %13, %20 : vector<8x128xi1>, vector<8x128xf32>
    %cst_12 = arith.constant dense<0.000000e+00> : vector<8xf32>
    %22 = vector.multi_reduction <add>, %21, %cst_12 [1] : vector<8x128xf32> to vector<8xf32>
    %23 = vector.shape_cast %22 : vector<8xf32> to vector<8x1xf32>
    %24 = arith.mulf %23, %23 : vector<8x1xf32>
    %cst_13 = arith.constant 1.000000e+00 : f32
    %25 = vector.broadcast %cst_13 : f32 to vector<8x1xf32>
    %26 = arith.subf %25, %24 : vector<8x1xf32>
    %cst_14 = arith.constant 9.99999993E-9 : f32
    %27 = vector.broadcast %cst_14 : f32 to vector<8x1xf32>
    %28 = arith.maximumf %26, %27 : vector<8x1xf32>
    %29 = math.sqrt %28 : vector<8x1xf32>
    %cst_15 = arith.constant 0.955336511 : f32
    %30 = vector.broadcast %cst_15 : f32 to vector<8x1xf32>
    %31 = arith.mulf %23, %30 : vector<8x1xf32>
    %cst_16 = arith.constant 0.295520216 : f32
    %32 = vector.broadcast %cst_16 : f32 to vector<8x1xf32>
    %33 = arith.mulf %29, %32 : vector<8x1xf32>
    %34 = arith.subf %31, %33 : vector<8x1xf32>
    %cst_17 = arith.constant -0.955336511 : f32
    %35 = vector.broadcast %cst_17 : f32 to vector<8x1xf32>
    %36 = arith.cmpf ogt, %23, %35 : vector<8x1xf32>
    %cst_18 = arith.constant 0.0886560603 : f32
    %37 = vector.broadcast %cst_18 : f32 to vector<8x1xf32>
    %38 = arith.subf %23, %37 : vector<8x1xf32>
    %39 = arith.select %36, %34, %38 : vector<8x1xi1>, vector<8x1xf32>
    %40 = arith.subf %39, %23 : vector<8x1xf32>
    %cst_19 = arith.constant 0.000000e+00 : f32
    %41 = vector.shape_cast %40 : vector<8x1xf32> to vector<8x1xf32>
    %42 = vector.broadcast %41 : vector<8x1xf32> to vector<8x128xf32>
    %43 = vector.broadcast %cst_19 : f32 to vector<8x128xf32>
    %44 = arith.select %19, %42, %43 : vector<8x128xi1>, vector<8x128xf32>
    %45 = arith.addf %13, %44 : vector<8x128xf32>
    %cst_20 = arith.constant 1.600000e+01 : f32
    %46 = vector.broadcast %cst_20 : f32 to vector<8x128xf32>
    %47 = arith.mulf %45, %46 : vector<8x128xf32>
    %c0_21 = arith.constant 0 : index
    %c0_22 = arith.constant 0 : index
    %48 = vector.load %arg7[%c0_21, %c0_22] : memref<8x128xf32, #tpu.memory_space<vmem>>, vector<8x128xf32>
    tpu.vector_store %arg7[%c0_21, %c0_22], %47 {strides = array<i32>} : memref<8x128xf32, #tpu.memory_space<vmem>>, vector<8x128xf32>,
    return
  }
  func.func @transform_0(%arg0: i32, %arg1: i32) -> (i32, i32) {
    %c0_i32 = arith.constant 0 : i32
    %c0_i32_0 = arith.constant 0 : i32
    return %arg0, %c0_i32 : i32, i32
  }
  func.func @transform_1(%arg0: i32, %arg1: i32) -> (i32, i32) {
    %c0_i32 = arith.constant 0 : i32
    %c0_i32_0 = arith.constant 0 : i32
    return %arg1, %c0_i32 : i32, i32
  }
  func.func @transform_2(%arg0: i32, %arg1: i32) -> (i32, i32) {
    %c0_i32 = arith.constant 0 : i32
    %c0_i32_0 = arith.constant 0 : i32
    return %c0_i32, %arg1 : i32, i32
  }
  func.func @transform_3(%arg0: i32, %arg1: i32) -> (i32, i32) {
    %c0_i32 = arith.constant 0 : i32
    %c0_i32_0 = arith.constant 0 : i32
    return %arg0, %c0_i32 : i32, i32
  }
  func.func @transform_4(%arg0: i32, %arg1: i32) -> (i32, i32) {
    %c0_i32 = arith.constant 0 : i32
    %c0_i32_0 = arith.constant 0 : i32
    return %arg0, %c0_i32 : i32, i32
  }
  func.func @transform_5(%arg0: i32, %arg1: i32) -> (i32, i32) {
    %c0_i32 = arith.constant 0 : i32
    return %arg0, %arg1 : i32, i32
  }
}

</mosaic_0001>

<bundles_post_ra>
// kernel: tpu_custom_call.1
= control target key start
LH: loop header
LB: loop body
LE: loop exit
PB: predicated region body
PF: predicated region fallthrough
CT: control target
= control target key end

     0   :  { %10 = vsyncpa [#allocation3], 0  ;;  %s1120_s0 = inlined_call_operand.vmem [shape: bf16[8,128], index: 0, kind: input, shape index: {}]   ;;  %s1121_s1 = inlined_call_operand.hbm [shape: bf16[512,128], index: 1, kind: input, shape index: {}]   ;;  %s1122_s2 = inlined_call_operand.vmem [shape: f32[1,512], index: 2, kind: input, shape index: {}]   ;;  %s1123_s3 = inlined_call_operand.vmem [shape: f32[8,1], index: 3, kind: input, shape index: {}]   ;;  %s1124_s4 = inlined_call_operand.vmem [shape: s32[8,1], index: 4, kind: input, shape index: {}]   ;;  %s1125_s5 = inlined_call_operand.hbm [shape: f32[8,512], index: 5, kind: output, shape index: {}]  }
   0x1   :  { %12 = vsyncpa [#allocation3 + $0x1], 0 }
   0x2   :  { %13 = vsyncpa [#allocation4], 0 }
   0x3   :  { %15 = vsyncpa [#allocation4 + $0x1], 0  ;;  %s918_s18 = smov 0   ;;  %s920_s19 = smov 0  }
   0x4   :  { %s922_s20 = smov 0   ;;  %s924_s21 = smov 0  }
   0x5   :  { %s926_s22 = smov 0   ;;  %s928_s23 = smov 0  }
   0x6 LB: > { %s630_s24 = sadd.s32 4294967295, %s879_s23   ;;  %s631_s25 = sadd.s32 4294967294, %s879_s23   ;;  %s879_s23 = sphi %s928_s23, %s21_s23   ;;  %s875_s22 = sphi %s926_s22, %s1139_s22   ;;  %s871_s21 = sphi %s924_s21, %s1138_s21   ;;  %s867_s20 = sphi %s922_s20, %s1137_s20   ;;  %s863_s19 = sphi %s920_s19, %s1136_s19   ;;  %s859_s18 = sphi %s918_s18, %s1135_s18  }
   0x7   : > { %s30_s26 = sadd.s32 1, %s875_s22  ;;  %s66_s27 = sadd.s32 1, %s867_s20 }
   0x8   : > { %p31_p0 = scmp.ge.s32.totalorder %s30_s26, 4  ;;  %p73_p1 = scmp.ne.s32.totalorder %s867_s20, %s863_s19 }
   0x9   : > { %p74_p2 = scmp.eq.s32.totalorder %s879_s23, 0  ;;  %p79_p3 = scmp.ne.s32.totalorder %s863_s19, %s859_s18 }
   0xa   : > { %s1141_s26 = smov (%p31_p0, %s30_s26), 0  ;;  %p80_p5 = scmp.eq.s32.totalorder %s630_s24, 0 }
   0xb   : > { %p959_p4 = por %p74_p2, %p73_p1  ;;  %s63_s29 = ssub.s32 %s875_s22, %s1141_s26 }
   0xc   : > { %p183_p6 = scmp.eq.s32.totalorder %s630_s24, 3  ;;  %p64_p7 = scmp.eq.s32.totalorder %s63_s29, 0 }
   0xd   : > { %p965_p8 = por %p80_p5, %p79_p3  ;;  %p189_p10 = scmp.eq.s32.totalorder %s631_s25, 3 }
   0xe   : > { %p969_p9 = por %p183_p6, %p73_p1  ;;  %p701_p12 = scmp.lt.s32.totalorder %s879_s23, 4 }
   0xf   : > { %s974_s7 = scalar_select %p64_p7, %s867_s20, %s66_s27  }
  0x10   : > { %s1129_s6 = scalar_select %p969_p9, 1, 0 }
  0x11   : > { %p976_p11 = por %p189_p10, %p79_p3  ;;  %s230_s9 = sand.u32 1, %s867_s20  }
  0x12   : > { %s637_s10 = sshll.u32 %s230_s9, 6  ;;  %s659_s11 = sshll.u32 %s875_s22, 10 }
  0x13   : > { %s1130_s8 = scalar_select %p976_p11, 1, 0 }
  0x14   : > { %s986_s14 = scalar_lea.hbm %s1121_s1, %s659_s11  ;;  %s234_s15 = scalar_lea.vmem [#allocation2], %s637_s10 }
  0x15   : > { %s241_s16 = sshll.u32 %s234_s15, 4  ;;  %p992_p13 = pnand %p701_p12, %p959_p4  ;;  %s988_s16 = int_to_ptr.vmem [resolvable:$true] %s241_s16 }
  0x16   : > { %s997_s24 = scalar_lea.sflag [#allocation3], %s230_s9  ;;  %s767_s25 = scalar_lea.hbm %s986_s14, 1024 }
  0x17   : > { %p768_p1 = scmp.ne.s32.totalorder %s986_s14, %s767_s25  ;;  %p769_p2 = pneg %p992_p13 }
  0x18   : > { %s772_s28 = scalar_lea.hbm %s1121_s1, 4096  ;;  %p773_p4 = scmp.lt.u32.totalorder %s986_s14, %s1121_s1 }
  0x19   : > { %p770_p3 = pnand %p769_p2, %p768_p1  ;;  %p774_p6 = scmp.lt.u32.totalorder %s772_s28, %s767_s25 }
  0x1a   : > { %p776_p10 = scmp.lt.u32.totalorder %s767_s25, %s986_s14 }
  0x1b   : > { %p771_p5 = pneg %p770_p3  ;;  %p775_p7 = por %p774_p6, %p773_p4 }
  0x1d   : > { %p777_p12 = por %p776_p10, %p775_p7 }
  0x1f   : > { %p778_p0 = pnand %p777_p12, %p771_p5 }
  0x21   : > { %781 = shalt.err (!%p778_p0)
}
  0x22   : > { %s782_s9 = scalar_lea.vmem %s988_s16, 1024  ;;  %s881_s12 = smov [#allocation2]  }
  0x23   : > { %p783_p1 = scmp.ne.s32.totalorder %s988_s16, %s782_s9  ;;  %s787_s13 = sshll.u32 %s881_s12, 4  ;;  %s788_s13 = int_to_ptr.vmem [resolvable:$false] %s787_s13 }
  0x24   : > { %s789_s15 = scalar_lea.vmem %s788_s13, 2048  ;;  %p790_p9 = scmp.lt.s32.totalorder %s988_s16, %s788_s13 }
  0x25   : > { %p785_p3 = pnand %p783_p1, %p769_p2  ;;  %p791_p4 = scmp.lt.s32.totalorder %s789_s15, %s782_s9 }
  0x27   : > { %p786_p11 = pneg %p785_p3  ;;  %p792_p6 = por %p791_p4, %p790_p9 }
  0x29   : > { %p793_p7 = pnand %p792_p6, %p786_p11 }
  0x2b   : > { %796 = shalt.err (!%p793_p7)
}
  0x2c   : > { %s882_s25 = smov 64   ;;  %s883_s27 = smov 4  }
  0x2d   : > { %696 = dma.hbm_to_vmem [thread:$0]  (!%p992_p13), %s986_s14, 1024, %s988_s16, %s997_s24, %s882_s25, %s882_s25, %s883_s27  }
  0x2e   : > { %p255_p0 = scmp.lt.s32.totalorder %s879_s23, 5  ;;  %p1132_p2 = scmp.ge.s32.totalorder %s879_s23, 1 }
  0x30   : > { %p256_p5 = pnand %p1132_p2, %p255_p0 }
  0x31   : > { %s1029_s29 = sand.u32 (!%p256_p5), 1, %s863_s19  }
  0x32   : > { %259 = sbr.rel (%p256_p5) target bundleno = 531 (0x213), region = 40  ;;  %s641_s28 = sshll.u32 (!%p256_p5), %s1029_s29, 6 }
  0x33   : > { %s262_s10 = scalar_lea.sflag (!%p256_p5), [#allocation3], %s1029_s29  ;;  %s1033_s11 = scalar_lea.vmem (!%p256_p5), [#allocation2], %s641_s28 }
  0x39   : > { %850 = dma.done.wait (%p965_p8), %s262_s10, 1024  }
  0x3a   : > { %852 = vsyncadd (%p965_p8), %s262_s10, 4294966272  ;;  %v884_v0 = vmov 0.0   ;;  %vm885_vm0 = vmmov 0   ;;  %v886_v1 = vmov 0   ;;  %v757_v2 = vld [vmem:[%s1033_s11] sm:$0xff]   ;;  %v758_v3 = vld [vmem:[%s1033_s11 + $0x8] sm:$0xff]   ;;  %v447_v13 = vlaneseq }
  0x3b   : > { %669 = vmatprep.subr.bf16.mxu0 %v884_v0  ;;  %685 = vmatprep.mubr.msk.bf16.mxu0 %vm885_vm0, %v884_v0  ;;  %v342_v4 = vld [vmem:[%s1123_s3] sm:$0xff]  ;;  %v759_v6 = vld [vmem:[%s1033_s11 + $0x10] sm:$0xff]   ;;  %v760_v7 = vld [vmem:[%s1033_s11 + $0x18] sm:$0xff]   ;;  %p312_p8 = scmp.lt.s32.totalorder %s871_s21, 3  ;;  %s653_s13 = sshll.u32 %s871_s21, 7 }
  0x3c   : > { %756 = vset.pattern.permute.xlu0 %v886_v1  ;;  %670 = vmatpush3.bf16.xpose.msra.mxu0 %v757_v2  ;;  %v343_v5 = vld [vmem:[%s1124_s4] sm:$0xff]  ;;  %v762_v9 = vld [vmem:[%s1033_s11 + $0x28] sm:$0xff]   ;;  %v763_v10 = vld [vmem:[%s1033_s11 + $0x30] sm:$0xff]   ;;  %v448_v15 = vand.u32 127, %v447_v13  ;;  %v450_v16 = vstv %s653_s13  ;;  %s642_s28 = sshll.u32 %s1029_s29, 3  ;;  %s1072_s30 = scalar_lea.hbm %s1125_s5, %s653_s13 }
  0x3d   : > { %671 = vmatprep.subr.bf16.mxu0 %v884_v0  ;;  %434 = vperm.xlu0 %756, %v342_v4   ;;  %v761_v8 = vld [vmem:[%s1033_s11 + $0x20] sm:$0xff]   ;;  %v764_v11 = vld [vmem:[%s1033_s11 + $0x38] sm:$0xff]   ;;  %s313_s12 = scalar_select %p312_p8, %s871_s21, 3 }
  0x3e   : > { %v324_v12 = vld [vmem:[%s1120_s0] sm:$0xf]  ;;  %v451_v21 = vadd.s32 %v450_v16, %v448_v15  ;;  %s306_s10 = scalar_lea.vmem [#allocation5], %s642_s28  ;;  %s481_s17 = scalar_lea.sflag [#allocation4], %s1029_s29 }
  0x3f   : > { %s314_s27 = scalar_lea.vmem %s1122_s2, %s313_s12  ;;  %s496_s11 = sshll.u32 %s306_s10, 4  ;;  %s1074_s11 = int_to_ptr.vmem [resolvable:$true] %s496_s11 }
  0x40   : > { %v651_v18 = vld [vmem:[%s314_s27] ss:$0 sm:$0xff]  ;;  %s797_s24 = scalar_lea.vmem %s1074_s11, 128  ;;  %p1133_p11 = scmp.ne.s32.totalorder %s1129_s6, 0 }
  0x41   : > { %453 = vperm.xlu0 %756, %v343_v5   ;;  %p798_p9 = scmp.ne.s32.totalorder %s1074_s11, %s797_s24  ;;  %s887_s9 = smov [#allocation5]  }
  0x42   : > { %s801_s21 = sshll.u32 %s887_s9, 4  ;;  %s802_s21 = int_to_ptr.vmem [resolvable:$false] %s801_s21 }
  0x43   : > { %p799_p13 = pnand %p798_p9, %p1133_p11  ;;  %s803_s12 = scalar_lea.vmem %s802_s21, 256 }
  0x44   : > { %672 = vmatpush3.bf16.xpose.msra.mxu0 %v758_v3  ;;  %p804_p12 = scmp.lt.s32.totalorder %s1074_s11, %s802_s21  ;;  %p805_p1 = scmp.lt.s32.totalorder %s803_s12, %s797_s24 }
  0x45   : > { %673 = vmatprep.subr.bf16.mxu0 %v884_v0  ;;  %p800_p10 = pneg %p799_p13 }
  0x46   : > { %p806_p3 = por %p805_p1, %p804_p12 }
  0x48   : > { %p807_p4 = pnand %p806_p3, %p800_p10 }
  0x4c   : > { %674 = vmatpush3.bf16.xpose.msra.mxu0 %v759_v6 }
  0x4d   : > { %675 = vmatprep.subr.bf16.mxu0 %v884_v0 }
  0x54   : > { %676 = vmatpush3.bf16.xpose.msra.mxu0 %v760_v7 }
  0x55   : > { %677 = vmatprep.subr.bf16.mxu0 %v884_v0 }
  0x5c   : > { %678 = vmatpush3.bf16.xpose.msra.mxu0 %v761_v8 }
  0x5d   : > { %679 = vmatprep.subr.bf16.mxu0 %v884_v0 }
  0x64   : > { %680 = vmatpush3.bf16.xpose.msra.mxu0 %v762_v9 }
  0x65   : > { %681 = vmatprep.subr.bf16.mxu0 %v884_v0 }
  0x6c   : > { %682 = vmatpush3.bf16.xpose.msra.mxu0 %v763_v10 }
  0x6d   : > { %683 = vmatprep.subr.bf16.mxu0 %v884_v0 }
  0x74   : > { %684 = vmatpush3.bf16.xpose.msra.mxu0 %v764_v11 }
  0x7b   : > { %686 = vmatmul.mubr.bf16.vlgmr.msra.gmra.mrb[0].mxu0 %v324_v12 }
  0xbc   : > { %v435_v14 = vpop.permute.xlu0 %434 }
  0xc0   : > { %v454_v23 = vpop.permute.xlu0 %453 }
  0xc1   : > { %vm455_vm1 = vcmp.eq.s32.totalorder %v451_v21, %v454_v23 }
 0x14e   : > { %v426_v17 = vpop.f32.mrb[0].mxu0 }
 0x14f   : > { %v437_v19 = vmul.f32 %v435_v14, %v426_v17  ;;  %v687_v20 = vpop.f32.mrb[1].mxu0 }
 0x150   : > { %v429_v22 = vpop.f32.mrb[2].mxu0 }
 0x151   : > { %v688_v24 = vpop.f32.mrb[3].mxu0  ;;  %v444_v25 = vmul.f32 %v651_v18, %v437_v19 }
 0x153   : > { %v652_v26 = vclamps-f32 %v444_v25, 0.9999999 }
 0x155   : > { %v456_v27 = vsel %vm455_vm1, %v652_v26, 0.0 }
 0x156   : > { %457 = vadd.xlane.f32.xlu1 %v456_v27 }
 0x1e3   : > { %v458_v28 = vpop.xlane.xlu1 %457 }
 0x1e4   : > { %v459_v29 = vmul.f32 %v458_v28, %v458_v28  ;;  %v469_v37 = vmul.f32 0.9553365, %v458_v28  ;;  %v654_v40 = vadd.f32 -0.08865606, %v458_v28  ;;  %vm472_vm4 = vcmp.gt.f32.partialorder %v458_v28, -0.9553365 }
 0x1e6   : > { %v460_v30 = vsub.f32 1.0, %v459_v29 }
 0x1e8   : > { %v461_v31 = vmax.f32 %v460_v30, 1e-08 }
 0x1ea   : > { %765 = vrsqrt.f32 %v461_v31  ;;  %vm464_vm2 = vcmp.eq.f32.partialorder %v461_v31, inf  ;;  %v467_v34 = vand.u32 2147483648, %v461_v31  ;;  %vm466_vm3 = vcmp.eq.f32.partialorder %v461_v31, 0.0 }
 0x1f4   : > { %v766_v32 = vpop.eup %765 }
 0x1f5   : > { %v463_v33 = vmul.f32 %v766_v32, %v461_v31 }
 0x1f7   : > { %v465_v35 = vsel %vm464_vm2, %v461_v31, %v463_v33 }
 0x1f8   : > { %v468_v36 = vsel %vm466_vm3, %v467_v34, %v465_v35 }
 0x1f9   : > { %v470_v38 = vmul.f32 0.29552022, %v468_v36 }
 0x1fb   : > { %v471_v39 = vsub.f32 %v469_v37, %v470_v38 }
 0x1fd   : > { %v474_v41 = vsel %vm472_vm4, %v471_v39, %v654_v40 }
 0x1fe   : > { %v475_v42 = vsub.f32 %v474_v41, %v458_v28 }
 0x200   : > { %v476_v43 = vsel %vm455_vm1, %v475_v42, 0.0 }
 0x201   : > { %v477_v44 = vadd.f32 %v652_v26, %v476_v43 }
 0x203   : > { %v478_v45 = vmul.f32 16.0, %v477_v44 }
 0x205   : > { %479 = vst [vmem:[%s306_s10] sm:$0xff] %v478_v45 }
 0x206   : > { %810 = shalt.err (!%p807_p4)
}
 0x207   : > { %s811_s29 = scalar_lea.hbm %s1072_s30, 128  ;;  %s815_s25 = scalar_lea.hbm %s1125_s5, 512 }
 0x208   : > { %p812_p6 = scmp.ne.s32.totalorder %s1072_s30, %s811_s29  ;;  %p816_p2 = scmp.lt.u32.totalorder %s1072_s30, %s1125_s5 }
 0x209   : > { %p817_p5 = scmp.lt.u32.totalorder %s815_s25, %s811_s29  ;;  %p819_p9 = scmp.lt.u32.totalorder %s811_s29, %s1072_s30 }
 0x20a   : > { %p813_p7 = pnand %p812_p6, %p1133_p11 }
 0x20b   : > { %p818_p8 = por %p817_p5, %p816_p2 }
 0x20c   : > { %p814_p0 = pneg %p813_p7 }
 0x20d   : > { %p820_p13 = por %p819_p9, %p818_p8 }
 0x20f   : > { %p821_p10 = pnand %p820_p13, %p814_p0 }
 0x211   : > { %824 = shalt.err (!%p821_p10)
}
 0x212   : > { %691 = dma.vmem_to_hbm [thread:$0]  (%p1133_p11), %s1074_s11, 128, %s1072_s30, %s481_s17  }
 0x213 PF: > { %p702_p12 = scmp.ge.s32.totalorder %s879_s23, 2  ;;  %s508_s10 = sand.u32 1, %s859_s18  }
 0x214   : > { %p1134_p1 = scmp.ne.s32.totalorder %s1130_s8, 0  ;;  %s509_s14 = scalar_lea.sflag [#allocation4], %s508_s10 }
 0x216   : > { %p698_p3 = pnand %p702_p12, %p1134_p1 }
 0x218   : > { %854 = dma.done.wait (!%p698_p3), %s509_s14, 128  }
 0x219   : > { %856 = vsyncadd (!%p698_p3), %s509_s14, 4294967168  ;;  %s21_s23 = sadd.s32 1, %s879_s23   ;;  %s1135_s18 = smov %s863_s19 }
 0x21a   : > { %p18_p4 = scmp.ge.s32.totalorder %s21_s23, 6   ;;  %s1136_s19 = smov %s867_s20 }
 0x21b   : > { %s1137_s20 = smov %s974_s7  ;;  %s1138_s21 = smov %s875_s22 }
 0x21c   : > { %s1139_s22 = smov %s1141_s26  ;;  %20 = sbr.rel (!%p18_p4) target bundleno = 6 (0x6), region = 97 }
 0x223   :  { %514 = vsyncpa [#allocation3], 1 }
 0x224   :  { %516 = vsyncpa [#allocation3 + $0x1], 1 }
 0x225   :  { %517 = vsyncpa [#allocation4], 1 }
 0x226   :  { %519 = vsyncpa [#allocation4 + $0x1], 1 }

</bundles_post_ra>
